<compile_context>
chip_gen: v7x
topology: tpu7x:2x2x1
jax: 0.10.0
libtpu: 0.0.40
codegen_flags: <defaults>
</compile_context>

<pallas_src>
import functools
from typing import Any, NamedTuple, Tuple

import jax
import jax.numpy as jnp
from jax.experimental import pallas as pl
from jax.experimental.pallas import tpu as pltpu


def _round_up(x, m):
    return (x + m - 1) // m * m


@functools.lru_cache(maxsize=1)
def _buffered1_supported():
    """One-time cached probe: can this build lower a constant, single-buffered
    (pl.Buffered(1)) BlockSpec under a 'parallel' grid?  Avoids any runtime
    try/except fallback in the forward path."""
    if not hasattr(pl, "Buffered"):
        return False
    try:
        def k(c_ref, x_ref, o_ref):
            o_ref[...] = x_ref[...] + c_ref[...]

        c = jnp.zeros((8, 128), jnp.float32)
        x = jnp.zeros((16, 128), jnp.float32)
        out = pl.pallas_call(
            k,
            out_shape=jax.ShapeDtypeStruct((16, 128), jnp.float32),
            grid=(2,),
            in_specs=[pl.BlockSpec((8, 128), lambda i: (0, 0),
                                   pipeline_mode=pl.Buffered(1)),
                      pl.BlockSpec((8, 128), lambda i: (i, 0))],
            out_specs=pl.BlockSpec((8, 128), lambda i: (i, 0)),
            compiler_params=pltpu.CompilerParams(
                dimension_semantics=("parallel",)),
        )(c, x)
        jax.block_until_ready(out)
        return True
    except Exception:
        return False


@functools.lru_cache(maxsize=1)
def _vmem_capacity_bytes():
    try:
        return int(pltpu.get_tpu_info().vmem_capacity_bytes)
    except Exception:
        return 64 << 20          # conservative v7x-class fallback


class PreparedParams(NamedTuple):
    wb: Tuple[Any, ...]          # padded/cast (w1,b1,w2,b2,w3,b3,w4,b4)
    nf: int
    tw: int
    nf_pad: int
    tw_pad: int
    compute_dtype: Any
    single_buffer_weights: bool


def prepare_params(params, compute_dtype=None):
    """Pad/cast weights ONCE (hoisted out of the per-call path).

    Weights are stored (in, out) = torch W^T; biases (1, out) are kept f32."""
    w1, b1, w2, b2, w3, b3, w4, b4 = params
    nf = int(w1.shape[0])
    tw = int(w4.shape[1])
    if compute_dtype is None:
        compute_dtype = w1.dtype
    compute_dtype = jnp.dtype(compute_dtype)

    nf_pad = _round_up(nf, 128)
    tw_pad = _round_up(tw, 128)          # lane-dense output -> unmasked vst

    def pad2(a, rows, cols, dtype):
        if a.dtype != dtype:
            a = a.astype(dtype)
        return jnp.pad(a, ((0, rows - a.shape[0]), (0, cols - a.shape[1])))

    wb = (
        pad2(w1, nf_pad, nf_pad, compute_dtype), pad2(b1, 1, nf_pad, jnp.float32),
        pad2(w2, nf_pad, nf_pad, compute_dtype), pad2(b2, 1, nf_pad, jnp.float32),
        pad2(w3, nf_pad, nf_pad, compute_dtype), pad2(b3, 1, nf_pad, jnp.float32),
        pad2(w4, nf_pad, tw_pad, compute_dtype), pad2(b4, 1, tw_pad, jnp.float32),
    )
    wb = tuple(jax.block_until_ready(a) for a in wb)   # materialize once, here
    return PreparedParams(wb, nf, tw, nf_pad, tw_pad, compute_dtype,
                          _buffered1_supported())


def _select_row_tiling(m_rows, max_tile=256):
    """Pick (row_tile, m_pad): >=2 grid steps (v7x megacore), <=256 rows/step,
    and minimal padded-row waste (row_tile tracks ceil(M/steps), 8-aligned)."""
    m8 = _round_up(max(m_rows, 1), 8)
    steps = max(2, pl.cdiv(m8, max_tile))
    row_tile = _round_up(pl.cdiv(m8, steps), 8)
    return row_tile, row_tile * steps


def _flatten_head_kernel(x_ref, w1_ref, b1_ref, w2_ref, b2_ref,
                         w3_ref, b3_ref, w4_ref, b4_ref, o_ref):
    # Residual / bias / relu chain in f32; matmul operands fed in the weights'
    # storage dtype (bf16 recommended) with an f32 MXU accumulator.
    h = x_ref[...].astype(jnp.float32)
    for w_ref, b_ref in ((w1_ref, b1_ref), (w2_ref, b2_ref), (w3_ref, b3_ref)):
        lin = jnp.dot(h.astype(w_ref.dtype), w_ref[...],
                      preferred_element_type=jnp.float32)
        lin = lin + b_ref[...]
        h = jnp.maximum(lin, 0.0) + h
    out = jnp.dot(h.astype(w4_ref.dtype), w4_ref[...],
                  preferred_element_type=jnp.float32)
    out = out + b4_ref[...]
    o_ref[...] = out.astype(o_ref.dtype)


def _call_kernel(x2d, wb, *, row_tile, nf_pad, tw_pad, out_dtype,
                 single_buffer_weights):
    m_pad = x2d.shape[0]
    grid = (m_pad // row_tile,)

    cd_size = x2d.dtype.itemsize
    out_size = jnp.dtype(out_dtype).itemsize
    const_bytes = sum(int(a.size) * a.dtype.itemsize for a in wb)
    wbuf = 1 if single_buffer_weights else 2
    io_bytes = 2 * row_tile * (nf_pad * cd_size + tw_pad * out_size)   # dbl-buffered x/out
    # In-kernel intermediates: h (f32) + lin (f32) + narrow cast of h + f32 out.
    interm_bytes = row_tile * nf_pad * (4 + 4 + cd_size) + row_tile * tw_pad * 4
    vmem_need = io_bytes + wbuf * const_bytes + interm_bytes

    cap = int(0.8 * _vmem_capacity_bytes())      # ~102 MiB v5e/v6e, ~51 MiB v7x
    vmem_limit = int(min(max(1.2 * vmem_need + (2 << 20), 16 << 20), cap))

    flops = 2 * m_pad * nf_pad * (3 * nf_pad + tw_pad)
    bytes_accessed = (int(x2d.size) * cd_size + const_bytes
                      + m_pad * tw_pad * out_size)
    cost = pl.CostEstimate(flops=flops, transcendentals=0,
                           bytes_accessed=bytes_accessed)

    if single_buffer_weights:
        # Constant index_map -> tile never re-fetched; single VMEM buffer
        # halves resident weight VMEM.
        def const_spec(shape):
            return pl.BlockSpec(shape, lambda i: (0, 0),
                                pipeline_mode=pl.Buffered(1))
    else:
        def const_spec(shape):
            return pl.BlockSpec(shape, lambda i: (0, 0))

    in_specs = [pl.BlockSpec((row_tile, nf_pad), lambda i: (i, 0))]
    in_specs += [const_spec(a.shape) for a in wb]

    return pl.pallas_call(
        _flatten_head_kernel,
        out_shape=jax.ShapeDtypeStruct((m_pad, tw_pad), out_dtype),
        grid_spec=pltpu.PrefetchScalarGridSpec(
            num_scalar_prefetch=0,
            grid=grid,
            in_specs=in_specs,
            out_specs=pl.BlockSpec((row_tile, tw_pad), lambda i: (i, 0)),
        ),
        compiler_params=pltpu.CompilerParams(
            dimension_semantics=("parallel",),
            vmem_limit_bytes=vmem_limit,
        ),
        cost_estimate=cost,
    )(x2d, *wb)


def flatten_head_forward(x, prepared: PreparedParams):
    """x: (B, n_vars, d_model, patch_num) -> (B, n_vars, target_window).

    Pure / jit-friendly: no host syncs, no runtime fallbacks. Weights must be
    pre-prepared with prepare_params()."""
    B, n_vars, d_model, patch_num = x.shape
    nf = d_model * patch_num
    assert nf == prepared.nf, "x feature dim does not match prepared params"
    M = B * n_vars
    out_dtype = x.dtype
    nf_pad, tw_pad = prepared.nf_pad, prepared.tw_pad

    row_tile, m_pad = _select_row_tiling(M)

    # Glue: flatten(start_dim=-2) + merge (B, n_vars) -> rows; pad to tiles.
    x2d = x.reshape(M, nf).astype(prepared.compute_dtype)
    x2d = jnp.pad(x2d, ((0, m_pad - M), (0, nf_pad - nf)))

    out_pad = _call_kernel(
        x2d, prepared.wb, row_tile=row_tile, nf_pad=nf_pad, tw_pad=tw_pad,
        out_dtype=out_dtype,
        single_buffer_weights=prepared.single_buffer_weights)
    return out_pad[:M, :prepared.tw].reshape(B, n_vars, prepared.tw)


def init_params(key, nf, target_window, dtype=jnp.float32):
    """nn.Linear-style init. Weights stored as (in, out) = torch W^T; bias (1, out)."""
    keys = jax.random.split(key, 8)

    def lin(kw, kb, fan_in, fan_out):
        bound = 1.0 / jnp.sqrt(fan_in)
        w = jax.random.uniform(kw, (fan_in, fan_out), dtype, -bound, bound)
        b = jax.random.uniform(kb, (1, fan_out), dtype, -bound, bound)
        return w, b

    w1, b1 = lin(keys[0], keys[1], nf, nf)
    w2, b2 = lin(keys[2], keys[3], nf, nf)
    w3, b3 = lin(keys[4], keys[5], nf, nf)
    w4, b4 = lin(keys[6], keys[7], nf, target_window)
    return (w1, b1, w2, b2, w3, b3, w4, b4)


def reference_forward(x, params, compute_dtype=None):
    """Pure-JAX reference mirroring the kernel's operand-quantization choices."""
    w1, b1, w2, b2, w3, b3, w4, b4 = params
    B, n_vars, d_model, patch_num = x.shape
    cd = compute_dtype if compute_dtype is not None else w1.dtype
    z = x.reshape(B, n_vars, d_model * patch_num).astype(cd).astype(jnp.float32)
    for w, b in ((w1, b1), (w2, b2), (w3, b3)):
        lin = jnp.dot(z.astype(cd), w.astype(cd),
                      preferred_element_type=jnp.float32)
        lin = lin + b.astype(jnp.float32)
        z = jnp.maximum(lin, 0.0) + z
    out = jnp.dot(z.astype(cd), w4.astype(cd),
                  preferred_element_type=jnp.float32)
    out = out + b4.astype(jnp.float32)
    return out.astype(x.dtype)


if __name__ == "__main__":
    # Small shapes consistent with Flatten_Head(individual=False); chosen to
    # exercise the row / nf / target_window padding paths.
    B, n_vars, d_model, patch_num = 3, 5, 12, 6   # M = 15, nf = 72 -> pads to 128
    nf = d_model * patch_num
    target_window = 24                            # pads to lane-dense 128

    key = jax.random.PRNGKey(0)
    kx, kp = jax.random.split(key)
    x = jax.random.normal(kx, (B, n_vars, d_model, patch_num), jnp.float32)
    params = init_params(kp, nf, target_window)

    # Exact f32 path (weights stored in f32). Params prepared ONCE, forward jitted.
    prep32 = prepare_params(params, compute_dtype=jnp.float32)
    fwd32 = jax.jit(lambda xx: flatten_head_forward(xx, prep32))
    y32 = jax.block_until_ready(fwd32(x))
    ref32 = reference_forward(x, params, compute_dtype=jnp.float32)
    assert y32.shape == (B, n_vars, target_window)
    assert jnp.allclose(y32, ref32, atol=1e-5, rtol=1e-5)

    # bf16 MXU path (recommended on v5e/v6e/v7x); compared against a reference
    # that quantizes matmul operands to bf16 exactly as the kernel does.
    # TODO(synk): optional fp8 weight-storage path for v7x (halves weight HBM/VMEM).
    prep16 = prepare_params(params, compute_dtype=jnp.bfloat16)
    fwd16 = jax.jit(lambda xx: flatten_head_forward(xx, prep16))
    y16 = jax.block_until_ready(fwd16(x))
    ref16 = reference_forward(x, params, compute_dtype=jnp.bfloat16)
    assert y16.shape == (B, n_vars, target_window)
    assert jnp.allclose(y16, ref16, atol=1e-2, rtol=1e-2)

    print("KERNEL_OK")
</pallas_src>

<mosaic_0001>
module attributes {stable_mosaic.version = 11 : i64} {
  func.func @k(%arg0: i32, %arg1: memref<8x128xf32, #tpu.memory_space<vmem>>, %arg2: memref<8x128xf32, #tpu.memory_space<vmem>>, %arg3: memref<8x128xf32, #tpu.memory_space<vmem>>) attributes {dimension_semantics = [#tpu.dimension_semantics<parallel>], iteration_bounds = array<i64: 2>, scalar_prefetch = 0 : i64, scratch_operands = 0 : i64, tpu.core_type = #tpu.core_type<tc>, window_params = [{pipeline_mode = #tpu.pipeline_mode<synchronous>, transform_indices = @transform_0, window_bounds = array<i64: 8, 128>}, {transform_indices = @transform_1, window_bounds = array<i64: 8, 128>}, {transform_indices = @transform_2, window_bounds = array<i64: 8, 128>}]} {
    %c0 = arith.constant 0 : index
    %c0_0 = arith.constant 0 : index
    %0 = vector.load %arg2[%c0, %c0_0] : memref<8x128xf32, #tpu.memory_space<vmem>>, vector<8x128xf32>
    %c0_1 = arith.constant 0 : index
    %c0_2 = arith.constant 0 : index
    %1 = vector.load %arg1[%c0_1, %c0_2] : memref<8x128xf32, #tpu.memory_space<vmem>>, vector<8x128xf32>
    %2 = arith.addf %0, %1 : vector<8x128xf32>
    %c0_3 = arith.constant 0 : index
    %c0_4 = arith.constant 0 : index
    %3 = vector.load %arg3[%c0_3, %c0_4] : memref<8x128xf32, #tpu.memory_space<vmem>>, vector<8x128xf32>
    tpu.vector_store %arg3[%c0_3, %c0_4], %2 {strides = array<i32>} : memref<8x128xf32, #tpu.memory_space<vmem>>, vector<8x128xf32>,
    return
  }
  func.func @transform_0(%arg0: i32) -> (i32, i32) {
    %c0_i32 = arith.constant 0 : i32
    %c0_i32_0 = arith.constant 0 : i32
    %c0_i32_1 = arith.constant 0 : i32
    return %c0_i32, %c0_i32_0 : i32, i32
  }
  func.func @transform_1(%arg0: i32) -> (i32, i32) {
    %c0_i32 = arith.constant 0 : i32
    %c0_i32_0 = arith.constant 0 : i32
    return %arg0, %c0_i32 : i32, i32
  }
  func.func @transform_2(%arg0: i32) -> (i32, i32) {
    %c0_i32 = arith.constant 0 : i32
    %c0_i32_0 = arith.constant 0 : i32
    return %arg0, %c0_i32 : i32, i32
  }
}

module attributes {stable_mosaic.version = 11 : i64} {
  func.func @_flatten_head_kernel(%arg0: i32, %arg1: memref<8x128xf32, #tpu.memory_space<vmem>>, %arg2: memref<128x128xf32, #tpu.memory_space<vmem>>, %arg3: memref<1x128xf32, #tpu.memory_space<vmem>>, %arg4: memref<128x128xf32, #tpu.memory_space<vmem>>, %arg5: memref<1x128xf32, #tpu.memory_space<vmem>>, %arg6: memref<128x128xf32, #tpu.memory_space<vmem>>, %arg7: memref<1x128xf32, #tpu.memory_space<vmem>>, %arg8: memref<128x128xf32, #tpu.memory_space<vmem>>, %arg9: memref<1x128xf32, #tpu.memory_space<vmem>>, %arg10: memref<8x128xf32, #tpu.memory_space<vmem>>) attributes {dimension_semantics = [#tpu.dimension_semantics<parallel>], iteration_bounds = array<i64: 2>, scalar_prefetch = 0 : i64, scratch_operands = 0 : i64, tpu.core_type = #tpu.core_type<tc>, window_params = [{transform_indices = @transform_0, window_bounds = array<i64: 8, 128>}, {pipeline_mode = #tpu.pipeline_mode<synchronous>, transform_indices = @transform_1, window_bounds = array<i64: 128, 128>}, {pipeline_mode = #tpu.pipeline_mode<synchronous>, transform_indices = @transform_2, window_bounds = array<i64: 1, 128>}, {pipeline_mode = #tpu.pipeline_mode<synchronous>, transform_indices = @transform_3, window_bounds = array<i64: 128, 128>}, {pipeline_mode = #tpu.pipeline_mode<synchronous>, transform_indices = @transform_4, window_bounds = array<i64: 1, 128>}, {pipeline_mode = #tpu.pipeline_mode<synchronous>, transform_indices = @transform_5, window_bounds = array<i64: 128, 128>}, {pipeline_mode = #tpu.pipeline_mode<synchronous>, transform_indices = @transform_6, window_bounds = array<i64: 1, 128>}, {pipeline_mode = #tpu.pipeline_mode<synchronous>, transform_indices = @transform_7, window_bounds = array<i64: 128, 128>}, {pipeline_mode = #tpu.pipeline_mode<synchronous>, transform_indices = @transform_8, window_bounds = array<i64: 1, 128>}, {transform_indices = @transform_9, window_bounds = array<i64: 8, 128>}]} {
    %c0 = arith.constant 0 : index
    %c0_0 = arith.constant 0 : index
    %0 = vector.load %arg1[%c0, %c0_0] : memref<8x128xf32, #tpu.memory_space<vmem>>, vector<8x128xf32>
    %c0_1 = arith.constant 0 : index
    %c0_2 = arith.constant 0 : index
    %1 = vector.load %arg2[%c0_1, %c0_2] : memref<128x128xf32, #tpu.memory_space<vmem>>, vector<128x128xf32>
    %cst = arith.constant dense<0.000000e+00> : vector<8x128xf32>
    %2 = tpu.matmul %0, %1, %cst {dimension_numbers = #tpu.dot_dimension_numbers<[1], [0], [0], [1], [0, 0, 1, 1], [], []>} : vector<8x128xf32>, vector<128x128xf32>, vector<8x128xf32> -> vector<8x128xf32>
    %c0_3 = arith.constant 0 : index
    %c0_4 = arith.constant 0 : index
    %3 = vector.load %arg3[%c0_3, %c0_4] : memref<1x128xf32, #tpu.memory_space<vmem>>, vector<1x128xf32>
    %4 = vector.broadcast %3 : vector<1x128xf32> to vector<8x128xf32>
    %5 = arith.addf %2, %4 : vector<8x128xf32>
    %cst_5 = arith.constant 0.000000e+00 : f32
    %6 = vector.broadcast %cst_5 : f32 to vector<8x128xf32>
    %7 = arith.maximumf %5, %6 : vector<8x128xf32>
    %8 = arith.addf %7, %0 : vector<8x128xf32>
    %c0_6 = arith.constant 0 : index
    %c0_7 = arith.constant 0 : index
    %9 = vector.load %arg4[%c0_6, %c0_7] : memref<128x128xf32, #tpu.memory_space<vmem>>, vector<128x128xf32>
    %cst_8 = arith.constant dense<0.000000e+00> : vector<8x128xf32>
    %10 = tpu.matmul %8, %9, %cst_8 {dimension_numbers = #tpu.dot_dimension_numbers<[1], [0], [0], [1], [0, 0, 1, 1], [], []>} : vector<8x128xf32>, vector<128x128xf32>, vector<8x128xf32> -> vector<8x128xf32>
    %c0_9 = arith.constant 0 : index
    %c0_10 = arith.constant 0 : index
    %11 = vector.load %arg5[%c0_9, %c0_10] : memref<1x128xf32, #tpu.memory_space<vmem>>, vector<1x128xf32>
    %12 = vector.broadcast %11 : vector<1x128xf32> to vector<8x128xf32>
    %13 = arith.addf %10, %12 : vector<8x128xf32>
    %cst_11 = arith.constant 0.000000e+00 : f32
    %14 = vector.broadcast %cst_11 : f32 to vector<8x128xf32>
    %15 = arith.maximumf %13, %14 : vector<8x128xf32>
    %16 = arith.addf %15, %8 : vector<8x128xf32>
    %c0_12 = arith.constant 0 : index
    %c0_13 = arith.constant 0 : index
    %17 = vector.load %arg6[%c0_12, %c0_13] : memref<128x128xf32, #tpu.memory_space<vmem>>, vector<128x128xf32>
    %cst_14 = arith.constant dense<0.000000e+00> : vector<8x128xf32>
    %18 = tpu.matmul %16, %17, %cst_14 {dimension_numbers = #tpu.dot_dimension_numbers<[1], [0], [0], [1], [0, 0, 1, 1], [], []>} : vector<8x128xf32>, vector<128x128xf32>, vector<8x128xf32> -> vector<8x128xf32>
    %c0_15 = arith.constant 0 : index
    %c0_16 = arith.constant 0 : index
    %19 = vector.load %arg7[%c0_15, %c0_16] : memref<1x128xf32, #tpu.memory_space<vmem>>, vector<1x128xf32>
    %20 = vector.broadcast %19 : vector<1x128xf32> to vector<8x128xf32>
    %21 = arith.addf %18, %20 : vector<8x128xf32>
    %cst_17 = arith.constant 0.000000e+00 : f32
    %22 = vector.broadcast %cst_17 : f32 to vector<8x128xf32>
    %23 = arith.maximumf %21, %22 : vector<8x128xf32>
    %24 = arith.addf %23, %16 : vector<8x128xf32>
    %c0_18 = arith.constant 0 : index
    %c0_19 = arith.constant 0 : index
    %25 = vector.load %arg8[%c0_18, %c0_19] : memref<128x128xf32, #tpu.memory_space<vmem>>, vector<128x128xf32>
    %cst_20 = arith.constant dense<0.000000e+00> : vector<8x128xf32>
    %26 = tpu.matmul %24, %25, %cst_20 {dimension_numbers = #tpu.dot_dimension_numbers<[1], [0], [0], [1], [0, 0, 1, 1], [], []>} : vector<8x128xf32>, vector<128x128xf32>, vector<8x128xf32> -> vector<8x128xf32>
    %c0_21 = arith.constant 0 : index
    %c0_22 = arith.constant 0 : index
    %27 = vector.load %arg9[%c0_21, %c0_22] : memref<1x128xf32, #tpu.memory_space<vmem>>, vector<1x128xf32>
    %28 = vector.broadcast %27 : vector<1x128xf32> to vector<8x128xf32>
    %29 = arith.addf %26, %28 : vector<8x128xf32>
    %c0_23 = arith.constant 0 : index
    %c0_24 = arith.constant 0 : index
    %30 = vector.load %arg10[%c0_23, %c0_24] : memref<8x128xf32, #tpu.memory_space<vmem>>, vector<8x128xf32>
    tpu.vector_store %arg10[%c0_23, %c0_24], %29 {strides = array<i32>} : memref<8x128xf32, #tpu.memory_space<vmem>>, vector<8x128xf32>,
    return
  }
  func.func @transform_0(%arg0: i32) -> (i32, i32) {
    %c0_i32 = arith.constant 0 : i32
    %c0_i32_0 = arith.constant 0 : i32
    return %arg0, %c0_i32 : i32, i32
  }
  func.func @transform_1(%arg0: i32) -> (i32, i32) {
    %c0_i32 = arith.constant 0 : i32
    %c0_i32_0 = arith.constant 0 : i32
    %c0_i32_1 = arith.constant 0 : i32
    return %c0_i32, %c0_i32_0 : i32, i32
  }
  func.func @transform_2(%arg0: i32) -> (i32, i32) {
    %c0_i32 = arith.constant 0 : i32
    %c0_i32_0 = arith.constant 0 : i32
    %c0_i32_1 = arith.constant 0 : i32
    return %c0_i32, %c0_i32_0 : i32, i32
  }
  func.func @transform_3(%arg0: i32) -> (i32, i32) {
    %c0_i32 = arith.constant 0 : i32
    %c0_i32_0 = arith.constant 0 : i32
    %c0_i32_1 = arith.constant 0 : i32
    return %c0_i32, %c0_i32_0 : i32, i32
  }
  func.func @transform_4(%arg0: i32) -> (i32, i32) {
    %c0_i32 = arith.constant 0 : i32
    %c0_i32_0 = arith.constant 0 : i32
    %c0_i32_1 = arith.constant 0 : i32
    return %c0_i32, %c0_i32_0 : i32, i32
  }
  func.func @transform_5(%arg0: i32) -> (i32, i32) {
    %c0_i32 = arith.constant 0 : i32
    %c0_i32_0 = arith.constant 0 : i32
    %c0_i32_1 = arith.constant 0 : i32
    return %c0_i32, %c0_i32_0 : i32, i32
  }
  func.func @transform_6(%arg0: i32) -> (i32, i32) {
    %c0_i32 = arith.constant 0 : i32
    %c0_i32_0 = arith.constant 0 : i32
    %c0_i32_1 = arith.constant 0 : i32
    return %c0_i32, %c0_i32_0 : i32, i32
  }
  func.func @transform_7(%arg0: i32) -> (i32, i32) {
    %c0_i32 = arith.constant 0 : i32
    %c0_i32_0 = arith.constant 0 : i32
    %c0_i32_1 = arith.constant 0 : i32
    return %c0_i32, %c0_i32_0 : i32, i32
  }
  func.func @transform_8(%arg0: i32) -> (i32, i32) {
    %c0_i32 = arith.constant 0 : i32
    %c0_i32_0 = arith.constant 0 : i32
    %c0_i32_1 = arith.constant 0 : i32
    return %c0_i32, %c0_i32_0 : i32, i32
  }
  func.func @transform_9(%arg0: i32) -> (i32, i32) {
    %c0_i32 = arith.constant 0 : i32
    %c0_i32_0 = arith.constant 0 : i32
    return %arg0, %c0_i32 : i32, i32
  }
}

</mosaic_0001>

<bundles_post_ra>
// kernel: tpu_custom_call.1
= control target key start
LH: loop header
LB: loop body
LE: loop exit
PB: predicated region body
PF: predicated region fallthrough
CT: control target
= control target key end

     0   :  { %7 = vsyncpa [#allocation3], 0  ;;  %s692_s0 = inlined_call_operand.hbm [shape: f32[8,128], index: 0, kind: input, shape index: {}]   ;;  %s693_s1 = inlined_call_operand.hbm [shape: f32[16,128], index: 1, kind: input, shape index: {}]   ;;  %s694_s2 = inlined_call_operand.hbm [shape: f32[16,128], index: 2, kind: output, shape index: {}]  }
   0x1   :  { %8 = vsyncpa [#allocation6], 0 }
   0x2   :  { %10 = vsyncpa [#allocation6 + $0x1], 0 }
   0x3   :  { %11 = vsyncpa [#allocation4], 0 }
   0x4   :  { %13 = vsyncpa [#allocation4 + $0x1], 0  ;;  %s491_s9 = smov 0   ;;  %s493_s10 = smov 0  }
   0x5   :  { %s495_s11 = smov 0   ;;  %s497_s12 = smov 0  }
   0x6 LB: > { %s512_s13 = sadd.s32 4294967295, %s471_s12   ;;  %s272_s14 = sadd.s32 4294967294, %s471_s12   ;;  %s471_s12 = sphi %s497_s12, %s718_s12   ;;  %s467_s11 = sphi %s495_s11, %s717_s11   ;;  %s463_s10 = sphi %s493_s10, %s716_s10   ;;  %s459_s9 = sphi %s491_s9, %s715_s9  }
   0x7   : > { %p60_p0 = scmp.ne.s32.totalorder %s463_s10, %s459_s9  ;;  %p695_p1 = scmp.eq.s32.totalorder %s512_s13, 0 }
   0x8   : > { %p90_p3 = scmp.eq.s32.totalorder %s272_s14, 1  ;;  %p273_p5 = scmp.ge.s32.totalorder %s471_s12, 1 }
   0x9   : > { %p521_p4 = por %p695_p1, %p60_p0  ;;  %p97_p7 = scmp.lt.s32.totalorder %s471_s12, 3 }
   0xa   : > { %p526_p6 = por %p90_p3, %p60_p0  ;;  %s473_s18 = smov [#allocation2]  }
   0xb   : > { %s698_s15 = scalar_select %p521_p4, 1, 0 }
   0xc   : > { %s699_s16 = scalar_select %p526_p6, 1, 0 }
   0xd   : > { %p531_p8 = pnand %p273_p5, %p97_p7  ;;  %s110_s19 = sshll.u32 %s473_s18, 4  ;;  %s111_s19 = int_to_ptr.vmem [resolvable:$true] %s110_s19 }
   0xe   : > { %s539_s20 = sadd.s32 1, %s471_s12   ;;  %s47_s24 = sadd.s32 1, %s467_s11 }
   0xf   : > { %s700_s17 = scalar_select %p531_p8, 1, 0 }
  0x10   : > { %p294_p10 = pneg %p531_p8  ;;  %s44_s22 = ssub.s32 %s471_s12, %s539_s20 }
  0x11   : > { %p549_p12 = scmp.eq.s32.totalorder %s44_s22, 0  ;;  %s343_s27 = scalar_lea.hbm %s692_s0, 128 }
  0x12   : > { %p543_p11 = pnand %p294_p10, %p695_p1  ;;  %p344_p0 = scmp.ne.s32.totalorder %s692_s0, %s343_s27 }
  0x13   : > { %s702_s23 = scalar_select %p549_p12, 1, 0 }
  0x14   : > { %p345_p3 = pneg %p543_p11  ;;  %p350_p10 = scmp.lt.u32.totalorder %s343_s27, %s692_s0 }
  0x16   : > { %p346_p5 = pnand %p345_p3, %p344_p0 }
  0x18   : > { %p347_p7 = pneg %p346_p5 }
  0x1a   : > { %p352_p9 = pnand %p350_p10, %p347_p7 }
  0x1c   : > { %355 = shalt.err (!%p352_p9)
}
  0x1d   : > { %s356_s4 = scalar_lea.vmem %s111_s19, 128  ;;  %p364_p6 = scmp.lt.s32.totalorder %s111_s19, %s111_s19 }
  0x1e   : > { %p357_p1 = scmp.ne.s32.totalorder %s111_s19, %s356_s4  ;;  %p365_p4 = scmp.lt.s32.totalorder %s356_s4, %s356_s4 }
  0x20   : > { %p359_p2 = pnand %p357_p1, %p345_p3  ;;  %p366_p8 = por %p365_p4, %p364_p6 }
  0x22   : > { %p360_p13 = pneg %p359_p2 }
  0x24   : > { %p367_p12 = pnand %p366_p8, %p360_p13 }
  0x26   : > { %370 = shalt.err (!%p367_p12)
}
  0x27   : > { %297 = dma.hbm_to_vmem [thread:$0]  (!%p543_p11), %s692_s0, 128, %s111_s19, [#allocation3]  }
  0x28   : > { %p703_p1 = scmp.ne.s32.totalorder %s702_s23, 0  ;;  %p55_p2 = scmp.eq.s32.totalorder %s471_s12, 0 }
  0x29   : > { %p704_p4 = scmp.ne.s32.totalorder %s467_s11, %s463_s10  ;;  %p705_p6 = scmp.eq.s32.totalorder %s512_s13, 1 }
  0x2a   : > { %s575_s7 = scalar_select %p703_p1, %s467_s11, %s47_s24  }
  0x2b   : > { %p583_p8 = por %p705_p6, %p704_p4  ;;  %p307_p9 = scmp.lt.s32.totalorder %s471_s12, 2 }
  0x2c   : > { %s121_s14 = sand.u32 1, %s467_s11   ;;  %p707_p12 = pmov %p704_p4 }
  0x2d   : > { %s276_s18 = sshll.u32 %s121_s14, 3  ;;  %s277_s21 = sshll.u32 %s471_s12, 7 }
  0x2e   : > { %p56_p13 = por %p55_p2, %p707_p12  ;;  %s596_s19 = scalar_lea.hbm %s693_s1, %s277_s21 }
  0x2f   : > { %s125_s23 = scalar_lea.vmem [#allocation5], %s276_s18  ;;  %s122_s27 = scalar_lea.sflag [#allocation6], %s121_s14 }
  0x30   : > { %s132_s24 = sshll.u32 %s125_s23, 4  ;;  %p598_p11 = pnand %p307_p9, %p56_p13  ;;  %s602_s24 = int_to_ptr.vmem [resolvable:$true] %s132_s24 }
  0x31   : > { %s371_s28 = scalar_lea.hbm %s596_s19, 128  ;;  %s376_s3 = scalar_lea.hbm %s693_s1, 256 }
  0x32   : > { %p372_p0 = scmp.ne.s32.totalorder %s596_s19, %s371_s28  ;;  %p373_p3 = pneg %p598_p11 }
  0x33   : > { %p377_p10 = scmp.lt.u32.totalorder %s596_s19, %s693_s1  ;;  %p378_p1 = scmp.lt.u32.totalorder %s376_s3, %s371_s28 }
  0x34   : > { %p374_p5 = pnand %p373_p3, %p372_p0  ;;  %p380_p4 = scmp.lt.u32.totalorder %s371_s28, %s596_s19 }
  0x35   : > { %p379_p2 = por %p378_p1, %p377_p10 }
  0x36   : > { %p375_p7 = pneg %p374_p5 }
  0x37   : > { %p381_p6 = por %p380_p4, %p379_p2 }
  0x39   : > { %p382_p9 = pnand %p381_p6, %p375_p7 }
  0x3b   : > { %385 = shalt.err (!%p382_p9)
}
  0x3c   : > { %s386_s6 = scalar_lea.vmem %s602_s24, 128  ;;  %s474_s14 = smov [#allocation5]  }
  0x3d   : > { %p387_p12 = scmp.ne.s32.totalorder %s602_s24, %s386_s6  ;;  %s391_s18 = sshll.u32 %s474_s14, 4  ;;  %s392_s18 = int_to_ptr.vmem [resolvable:$false] %s391_s18 }
  0x3e   : > { %s393_s21 = scalar_lea.vmem %s392_s18, 256  ;;  %p394_p5 = scmp.lt.s32.totalorder %s602_s24, %s392_s18 }
  0x3f   : > { %p389_p13 = pnand %p387_p12, %p373_p3  ;;  %p395_p10 = scmp.lt.s32.totalorder %s393_s21, %s386_s6 }
  0x41   : > { %p390_p0 = pneg %p389_p13  ;;  %p396_p1 = por %p395_p10, %p394_p5 }
  0x43   : > { %p397_p2 = pnand %p396_p1, %p390_p0 }
  0x45   : > { %400 = shalt.err (!%p397_p2)
}
  0x46   : > { %301 = dma.hbm_to_vmem [thread:$0]  (!%p598_p11), %s596_s19, 128, %s602_s24, %s122_s27  }
  0x47   : > { %p709_p7 = scmp.ne.s32.totalorder %s700_s17, 0 }
  0x48   : > { %p710_p3 = scmp.eq.s32.totalorder (!%p709_p7), %s512_s13, 0 }
  0x49   : > { %141 = sbr.rel (%p709_p7) target bundleno = 110 (0x6e), region = 28 }
  0x50   : > { %446 = dma.done.wait (%p710_p3), [#allocation3], 128   ;;  %p711_p4 = pmov %p710_p3 }
  0x51   : > { %s636_s22 = sand.u32 1, %s463_s10   ;;  %p712_p6 = scmp.ne.s32.totalorder %s698_s15, 0 }
  0x52   : > { %448 = vsyncadd (%p711_p4), [#allocation3], 4294967168  ;;  %s280_s25 = sshll.u32 %s636_s22, 3  ;;  %s148_s23 = scalar_lea.sflag [#allocation6], %s636_s22 }
  0x53   : > { %s151_s26 = scalar_lea.vmem [#allocation5], %s280_s25 }
  0x54   : > { %450 = dma.done.wait (%p712_p6), %s148_s23, 128  }
  0x55   : > { %452 = vsyncadd (%p712_p6), %s148_s23, 4294967168  ;;  %s171_s17 = scalar_lea.vmem [#allocation7], %s280_s25  ;;  %s283_s24 = sshll.u32 %s512_s13, 7  ;;  %v172_v0 = vld [vmem:[%s151_s26] sm:$0xff]  ;;  %v173_v1 = vld [vmem:[#allocation2] sm:$0xff] }
  0x56   : > { %s190_s19 = sshll.u32 %s171_s17, 4  ;;  %v174_v2 = vadd.f32 %v173_v1, %v172_v0  ;;  %s650_s29 = scalar_lea.hbm %s694_s2, %s283_s24  ;;  %s645_s19 = int_to_ptr.vmem [resolvable:$true] %s190_s19 }
  0x57   : > { %s177_s15 = scalar_lea.sflag [#allocation4], %s636_s22  ;;  %s401_s30 = scalar_lea.vmem %s645_s19, 128 }
  0x58   : > { %175 = vst [vmem:[%s171_s17] sm:$0xff] %v174_v2  ;;  %p402_p11 = scmp.ne.s32.totalorder %s645_s19, %s401_s30  ;;  %s475_s13 = smov [#allocation7]  }
  0x59   : > { %s405_s3 = sshll.u32 %s475_s13, 4  ;;  %s406_s3 = int_to_ptr.vmem [resolvable:$false] %s405_s3 }
  0x5a   : > { %p403_p9 = pnand %p402_p11, %p583_p8  ;;  %s407_s4 = scalar_lea.vmem %s406_s3, 256 }
  0x5b   : > { %p408_p13 = scmp.lt.s32.totalorder %s645_s19, %s406_s3  ;;  %p409_p0 = scmp.lt.s32.totalorder %s407_s4, %s401_s30 }
  0x5c   : > { %p404_p12 = pneg %p403_p9 }
  0x5d   : > { %p410_p5 = por %p409_p0, %p408_p13 }
  0x5f   : > { %p411_p10 = pnand %p410_p5, %p404_p12 }
  0x61   : > { %414 = shalt.err (!%p411_p10)
}
  0x62   : > { %s415_s5 = scalar_lea.hbm %s650_s29, 128  ;;  %s419_s18 = scalar_lea.hbm %s694_s2, 256 }
  0x63   : > { %p416_p1 = scmp.ne.s32.totalorder %s650_s29, %s415_s5  ;;  %p420_p3 = scmp.lt.u32.totalorder %s650_s29, %s694_s2 }
  0x64   : > { %p421_p4 = scmp.lt.u32.totalorder %s419_s18, %s415_s5  ;;  %p423_p11 = scmp.lt.u32.totalorder %s415_s5, %s650_s29 }
  0x65   : > { %p417_p2 = pnand %p416_p1, %p583_p8 }
  0x66   : > { %p422_p6 = por %p421_p4, %p420_p3 }
  0x67   : > { %p418_p7 = pneg %p417_p2 }
  0x68   : > { %p424_p9 = por %p423_p11, %p422_p6 }
  0x6a   : > { %p425_p12 = pnand %p424_p9, %p418_p7 }
  0x6c   : > { %428 = shalt.err (!%p425_p12)
}
  0x6d   : > { %292 = dma.vmem_to_hbm [thread:$0]  (%p583_p8), %s645_s19, 128, %s650_s29, %s177_s15  }
  0x6e PF: > { %s202_s25 = sand.u32 1, %s459_s9   ;;  %p713_p13 = scmp.ne.s32.totalorder %s699_s16, 0 }
  0x6f   : > { %p714_p0 = scmp.ge.s32.totalorder %s471_s12, 2  ;;  %s203_s23 = scalar_lea.sflag [#allocation4], %s202_s25 }
  0x71   : > { %p303_p5 = pnand %p714_p0, %p713_p13 }
  0x73   : > { %454 = dma.done.wait (!%p303_p5), %s203_s23, 128  }
  0x74   : > { %456 = vsyncadd (!%p303_p5), %s203_s23, 4294967168  ;;  %p16_p10 = scmp.ge.s32.totalorder %s539_s20, 4   ;;  %s715_s9 = smov %s463_s10 }
  0x75   : > { %s716_s10 = smov %s467_s11  ;;  %s717_s11 = smov %s575_s7 }
  0x76   : > { %s718_s12 = smov %s539_s20  ;;  %18 = sbr.rel (!%p16_p10) target bundleno = 6 (0x6), region = 78 }
  0x7d   :  { %208 = vsyncpa [#allocation3], 1 }
  0x7e   :  { %210 = vsyncpa [#allocation3 + $0x1], 1 }
  0x7f   :  { %211 = vsyncpa [#allocation6], 1 }
  0x80   :  { %213 = vsyncpa [#allocation6 + $0x1], 1 }
  0x81   :  { %214 = vsyncpa [#allocation4], 1 }
  0x82   :  { %216 = vsyncpa [#allocation4 + $0x1], 1 }

// kernel: _lambda_.1
= control target key start
LH: loop header
LB: loop body
LE: loop exit
PB: predicated region body
PF: predicated region fallthrough
CT: control target
= control target key end

     0   :  { %s1150_s30 = smov 0   ;;  %s1422_s0 = inlined_call_operand.vmem [shape: f32[16,128], index: 0, kind: input, shape index: {}]   ;;  %s1423_s1 = inlined_call_operand.vmem [shape: f32[128,128], index: 1, kind: input, shape index: {}]   ;;  %s1424_s2 = inlined_call_operand.vmem [shape: f32[1,128], index: 2, kind: input, shape index: {}]   ;;  %s1425_s3 = inlined_call_operand.vmem [shape: f32[128,128], index: 3, kind: input, shape index: {}]   ;;  %s1426_s4 = inlined_call_operand.vmem [shape: f32[1,128], index: 4, kind: input, shape index: {}]   ;;  %s1427_s5 = inlined_call_operand.vmem [shape: f32[128,128], index: 5, kind: input, shape index: {}]   ;;  %s1428_s6 = inlined_call_operand.vmem [shape: f32[1,128], index: 6, kind: input, shape index: {}]   ;;  %s1429_s7 = inlined_call_operand.vmem [shape: f32[128,128], index: 7, kind: input, shape index: {}]   ;;  %s1430_s8 = inlined_call_operand.vmem [shape: f32[1,128], index: 8, kind: input, shape index: {}]   ;;  %s1431_s9 = inlined_call_operand.vmem [shape: f32[16,128], index: 9, kind: output, shape index: {}]  }
   0x1 LB: > { %s761_s10 = sadd.s32 4294967295, %s1095_s30   ;;  %p765_p0 = scmp.ge.s32.totalorder %s1095_s30, 1  ;;  %s1095_s30 = sphi %s1150_s30, %s19_s30  }
   0x2   : > { %p286_p1 = scmp.lt.s32.totalorder %s1095_s30, 3 }
   0x4   : > { %p287_p2 = pnand %p765_p0, %p286_p1 }
   0x5   : > { %v329_v0 = vld [vmem:[%s1423_s1] sm:$0xff] (!%p287_p2)  ;;  %v330_v1 = vld [vmem:[%s1423_s1 + $0x8] sm:$0xff] (!%p287_p2)  ;;  %v331_v2 = vld [vmem:[%s1423_s1 + $0x10] sm:$0xff] (!%p287_p2)  ;;  %v1097_v3 = vmov (!%p287_p2), 0.0|0.0   ;;  %vm1098_vm0 = vmmov (!%p287_p2), 0   ;;  %v1099_v6 = vmov (!%p287_p2), 0.0  }
   0x6   : > { %290 = sbr.rel (%p287_p2) target bundleno = 908 (0x38c), region = 56  ;;  %982 = vmatprep.subr.bf16.mxu0 (!%p287_p2), %v1097_v3  ;;  %v983_v4 = vpack.c.bf16 (!%p287_p2), %v330_v1, %v329_v0  ;;  %v332_v5 = vld [vmem:[%s1423_s1 + $0x18] sm:$0xff] (!%p287_p2)  ;;  %874 = vmatprep.mubr.msk.f32.mxu0 (!%p287_p2), %vm1098_vm0, %v1099_v6  ;;  %v333_v8 = vld [vmem:[%s1423_s1 + $0x20] sm:$0xff] (!%p287_p2)  ;;  %v334_v9 = vld [vmem:[%s1423_s1 + $0x28] sm:$0xff] (!%p287_p2)  ;;  %p320_p3 = scmp.lt.s32.totalorder (!%p287_p2), %s761_s10, 1 }
   0x7   : > { %1006 = vmatprep.subr.bf16.mxu1 (!%p287_p2), %v1097_v3  ;;  %909 = vmatprep.mubr.msk.f32.mxu1 (!%p287_p2), %vm1098_vm0, %v1099_v6  ;;  %v986_v7 = vpack.c.bf16 (!%p287_p2), %v332_v5, %v331_v2  ;;  %v424_v10 = vld [vmem:[%s1425_s3] sm:$0xff] (!%p287_p2)  ;;  %v425_v11 = vld [vmem:[%s1425_s3 + $0x8] sm:$0xff] (!%p287_p2)  ;;  %v426_v13 = vld [vmem:[%s1425_s3 + $0x10] sm:$0xff] (!%p287_p2)  ;;  %v989_v15 = vpack.c.bf16 (!%p287_p2), %v334_v9, %v333_v8 }
   0x8   : > { %984 = vmatpush3.bf16.msra.mxu0 (!%p287_p2), %v983_v4  ;;  %v1007_v12 = vpack.c.bf16 (!%p287_p2), %v425_v11, %v424_v10  ;;  %v427_v14 = vld [vmem:[%s1425_s3 + $0x18] sm:$0xff] (!%p287_p2)  ;;  %v335_v16 = vld [vmem:[%s1423_s1 + $0x30] sm:$0xff] (!%p287_p2)  ;;  %v428_v19 = vld [vmem:[%s1425_s3 + $0x20] sm:$0xff] (!%p287_p2) }
   0x9   : > { %985 = vmatprep.subr.bf16.mxu0 (!%p287_p2), %v1097_v3  ;;  %v336_v17 = vld [vmem:[%s1423_s1 + $0x38] sm:$0xff] (!%p287_p2)  ;;  %v1010_v18 = vpack.c.bf16 (!%p287_p2), %v427_v14, %v426_v13  ;;  %v429_v20 = vld [vmem:[%s1425_s3 + $0x28] sm:$0xff] (!%p287_p2)  ;;  %v337_v22 = vld [vmem:[%s1423_s1 + $0x40] sm:$0xff] (!%p287_p2) }
   0xa   : > { %1008 = vmatpush3.bf16.msra.mxu1 (!%p287_p2), %v1007_v12  ;;  %v992_v21 = vpack.c.bf16 (!%p287_p2), %v336_v17, %v335_v16  ;;  %v338_v23 = vld [vmem:[%s1423_s1 + $0x48] sm:$0xff] (!%p287_p2)  ;;  %v1013_v24 = vpack.c.bf16 (!%p287_p2), %v429_v20, %v428_v19  ;;  %v430_v25 = vld [vmem:[%s1425_s3 + $0x30] sm:$0xff] (!%p287_p2)  ;;  %v431_v26 = vld [vmem:[%s1425_s3 + $0x38] sm:$0xff] (!%p287_p2) }
   0xb   : > { %1009 = vmatprep.subr.bf16.mxu1 (!%p287_p2), %v1097_v3  ;;  %v995_v27 = vpack.c.bf16 (!%p287_p2), %v338_v23, %v337_v22  ;;  %v339_v28 = vld [vmem:[%s1423_s1 + $0x50] sm:$0xff] (!%p287_p2)  ;;  %v340_v29 = vld [vmem:[%s1423_s1 + $0x58] sm:$0xff] (!%p287_p2)  ;;  %v1016_v30 = vpack.c.bf16 (!%p287_p2), %v431_v26, %v430_v25  ;;  %v432_v31 = vld [vmem:[%s1425_s3 + $0x40] sm:$0xff] (!%p287_p2) }
   0xc   : > { %987 = vmatpush3.bf16.msra.mxu0 (!%p287_p2), %v986_v7  ;;  %v433_v32 = vld [vmem:[%s1425_s3 + $0x48] sm:$0xff] (!%p287_p2)  ;;  %v998_v33 = vpack.c.bf16 (!%p287_p2), %v340_v29, %v339_v28  ;;  %v341_v34 = vld [vmem:[%s1423_s1 + $0x60] sm:$0xff] (!%p287_p2)  ;;  %v434_v37 = vld [vmem:[%s1425_s3 + $0x50] sm:$0xff] (!%p287_p2) }
   0xd   : > { %988 = vmatprep.subr.bf16.mxu0 %v1097_v3  ;;  %v342_v35 = vld [vmem:[%s1423_s1 + $0x68] sm:$0xff]  ;;  %v1019_v36 = vpack.c.bf16 %v433_v32, %v432_v31  ;;  %s1433_s10 = smov (!%p320_p3, %s761_s10), 1  ;;  %v435_v38 = vld [vmem:[%s1425_s3 + $0x58] sm:$0xff]  ;;  %v343_v40 = vld [vmem:[%s1423_s1 + $0x70] sm:$0xff] }
   0xe   : > { %1011 = vmatpush3.bf16.msra.mxu1 %v1010_v18  ;;  %v1001_v39 = vpack.c.bf16 %v342_v35, %v341_v34  ;;  %v344_v41 = vld [vmem:[%s1423_s1 + $0x78] sm:$0xff]  ;;  %v1022_v42 = vpack.c.bf16 %v435_v38, %v434_v37  ;;  %s766_s29 = sshll.u32 %s1433_s10, 3  ;;  %v436_v45 = vld [vmem:[%s1425_s3 + $0x60] sm:$0xff]  ;;  %v437_v46 = vld [vmem:[%s1425_s3 + $0x68] sm:$0xff] }
   0xf   : > { %1012 = vmatprep.subr.bf16.mxu1 %v1097_v3  ;;  %v1004_v43 = vpack.c.bf16 %v344_v41, %v343_v40  ;;  %s323_s13 = scalar_lea.vmem %s1422_s0, %s766_s29  ;;  %v1025_v47 = vpack.c.bf16 %v437_v46, %v436_v45  ;;  %v438_v48 = vld [vmem:[%s1425_s3 + $0x70] sm:$0xff]  ;;  %v439_v49 = vld [vmem:[%s1425_s3 + $0x78] sm:$0xff]  ;;  %v519_v51 = vld [vmem:[%s1427_s5] sm:$0xff]  ;;  %s327_s24 = scalar_lea.vmem %s1431_s9, %s766_s29 }
  0x10   : > { %990 = vmatpush3.bf16.msra.mxu0 %v989_v15  ;;  %v328_v44 = vld [vmem:[%s323_s13] sm:$0xff]  ;;  %v1028_v50 = vpack.c.bf16 %v439_v49, %v438_v48  ;;  %v520_v52 = vld [vmem:[%s1427_s5 + $0x8] sm:$0xff]  ;;  %v521_v53 = vld [vmem:[%s1427_s5 + $0x10] sm:$0xff] }
  0x11   : > { %991 = vmatprep.subr.bf16.mxu0 %v1097_v3  ;;  %v1031_v54 = vpack.c.bf16 %v520_v52, %v519_v51  ;;  %v522_v55 = vld [vmem:[%s1427_s5 + $0x18] sm:$0xff]  ;;  %v523_v57 = vld [vmem:[%s1427_s5 + $0x20] sm:$0xff]  ;;  %v524_v58 = vld [vmem:[%s1427_s5 + $0x28] sm:$0xff] }
  0x12   : > { %1014 = vmatpush3.bf16.msra.mxu1 %v1013_v24  ;;  %v1034_v56 = vpack.c.bf16 %v522_v55, %v521_v53  ;;  %v1037_v59 = vpack.c.bf16 %v524_v58, %v523_v57  ;;  %v525_v60 = vld [vmem:[%s1427_s5 + $0x30] sm:$0xff]  ;;  %v526_v61 = vld [vmem:[%s1427_s5 + $0x38] sm:$0xff]  ;;  %v527_v63 = vld [vmem:[%s1427_s5 + $0x40] sm:$0xff] }
  0x13   : > { %1015 = vmatprep.subr.bf16.mxu1 %v1097_v3  ;;  %v1040_v62 = vpack.c.bf16 %v526_v61, %v525_v60  ;;  %v528_v0 = vld [vmem:[%s1427_s5 + $0x48] sm:$0xff]  ;;  %v529_v2 = vld [vmem:[%s1427_s5 + $0x50] sm:$0xff]  ;;  %v530_v4 = vld [vmem:[%s1427_s5 + $0x58] sm:$0xff] }
  0x14   : > { %993 = vmatpush3.bf16.msra.mxu0 %v992_v21  ;;  %v1043_v1 = vpack.c.bf16 %v528_v0, %v527_v63  ;;  %v1046_v5 = vpack.c.bf16 %v530_v4, %v529_v2  ;;  %v768_v7 = vld [vmem:[%s1424_s2] ss:$0 sm:$0xff]  ;;  %v532_v14 = vld [vmem:[%s1427_s5 + $0x68] sm:$0xff]  ;;  %v533_v16 = vld [vmem:[%s1427_s5 + $0x70] sm:$0xff] }
  0x15   : > { %994 = vmatprep.subr.bf16.mxu0 %v1097_v3  ;;  %v531_v13 = vld [vmem:[%s1427_s5 + $0x60] sm:$0xff]  ;;  %v615_v19 = vld [vmem:[%s1429_s7 + $0x8] sm:$0xff]  ;;  %v616_v20 = vld [vmem:[%s1429_s7 + $0x10] sm:$0xff] }
  0x16   : > { %1017 = vmatpush3.bf16.msra.mxu1 %v1016_v30  ;;  %v1049_v15 = vpack.c.bf16 %v532_v14, %v531_v13  ;;  %v614_v18 = vld [vmem:[%s1429_s7] sm:$0xff]  ;;  %v617_v22 = vld [vmem:[%s1429_s7 + $0x18] sm:$0xff]  ;;  %v619_v25 = vld [vmem:[%s1429_s7 + $0x28] sm:$0xff] }
  0x17   : > { %1018 = vmatprep.subr.bf16.mxu1 %v1097_v3  ;;  %v1055_v21 = vpack.c.bf16 %v615_v19, %v614_v18  ;;  %v1058_v23 = vpack.c.bf16 %v617_v22, %v616_v20  ;;  %v618_v24 = vld [vmem:[%s1429_s7 + $0x20] sm:$0xff]  ;;  %v621_v28 = vld [vmem:[%s1429_s7 + $0x38] sm:$0xff]  ;;  %v623_v31 = vld [vmem:[%s1429_s7 + $0x48] sm:$0xff] }
  0x18   : > { %996 = vmatpush3.bf16.msra.mxu0 %v995_v27  ;;  %v1061_v26 = vpack.c.bf16 %v619_v25, %v618_v24  ;;  %v620_v27 = vld [vmem:[%s1429_s7 + $0x30] sm:$0xff]  ;;  %v622_v30 = vld [vmem:[%s1429_s7 + $0x40] sm:$0xff]  ;;  %v625_v34 = vld [vmem:[%s1429_s7 + $0x58] sm:$0xff] }
  0x19   : > { %997 = vmatprep.subr.bf16.mxu0 %v1097_v3  ;;  %v1064_v29 = vpack.c.bf16 %v621_v28, %v620_v27  ;;  %v1067_v32 = vpack.c.bf16 %v623_v31, %v622_v30  ;;  %v628_v45 = vld [vmem:[%s1429_s7 + $0x70] sm:$0xff]  ;;  %v629_v46 = vld [vmem:[%s1429_s7 + $0x78] sm:$0xff]  ;;  %v770_v48 = vld [vmem:[%s1428_s6] ss:$0 sm:$0xff] }
  0x1a   : > { %1020 = vmatpush3.bf16.msra.mxu1 %v1019_v36  ;;  %v769_v36 = vld [vmem:[%s1426_s4] ss:$0 sm:$0xff] }
  0x1b   : > { %1021 = vmatprep.subr.bf16.mxu1 %v1097_v3 }
  0x1c   : > { %999 = vmatpush3.bf16.msra.mxu0 %v998_v33  ;;  %v624_v33 = vld [vmem:[%s1429_s7 + $0x50] sm:$0xff] }
  0x1d   : > { %1000 = vmatprep.subr.bf16.mxu0 %v1097_v3  ;;  %v1070_v35 = vpack.c.bf16 %v625_v34, %v624_v33 }
  0x1e   : > { %1023 = vmatpush3.bf16.msra.mxu1 %v1022_v42  ;;  %v626_v42 = vld [vmem:[%s1429_s7 + $0x60] sm:$0xff] }
  0x1f   : > { %1024 = vmatprep.subr.bf16.mxu1 %v1097_v3 }
  0x20   : > { %1002 = vmatpush3.bf16.msra.mxu0 %v1001_v39 }
  0x21   : > { %1003 = vmatprep.subr.bf16.mxu0 %v1097_v3 }
  0x22   : > { %1026 = vmatpush3.bf16.msra.mxu1 %v1025_v47  ;;  %v1076_v47 = vpack.c.bf16 %v629_v46, %v628_v45 }
  0x23   : > { %1027 = vmatprep.subr.bf16.mxu1 %v1097_v3 }
  0x24   : > { %1005 = vmatpush3.bf16.msra.mxu0 %v1004_v43  ;;  %v627_v43 = vld [vmem:[%s1429_s7 + $0x68] sm:$0xff] }
  0x25   : > { %1030 = vmatprep.subr.bf16.mxu0 %v1097_v3 }
  0x26   : > { %1029 = vmatpush3.bf16.msra.mxu1 %v1028_v50 }
  0x27   : > { %875 = vmatmul.mubr.f32.vlgmr.msra.gmra.mrb[0].mxu0 %v328_v44  ;;  %1054 = vmatprep.subr.bf16.mxu1 %v1097_v3 }
  0x28   : > { %944 = vmatprep.mubr.msk.f32.mxu0 %vm1098_vm0, %v1099_v6  ;;  %1032 = vmatpush3.bf16.msra.mxu0 %v1031_v54 }
  0x29   : > { %1033 = vmatprep.subr.bf16.mxu0 %v1097_v3 }
  0x2c   : > { %1035 = vmatpush3.bf16.msra.mxu0 %v1034_v56 }
  0x2d   : > { %1036 = vmatprep.subr.bf16.mxu0 %v1097_v3 }
  0x30   : > { %1038 = vmatpush3.bf16.msra.mxu0 %v1037_v59 }
  0x31   : > { %1039 = vmatprep.subr.bf16.mxu0 %v1097_v3 }
  0x34   : > { %1041 = vmatpush3.bf16.msra.mxu0 %v1040_v62 }
  0x35   : > { %1042 = vmatprep.subr.bf16.mxu0 %v1097_v3 }
  0x38   : > { %1044 = vmatpush3.bf16.msra.mxu0 %v1043_v1 }
  0x39   : > { %1045 = vmatprep.subr.bf16.mxu0 %v1097_v3 }
  0x3c   : > { %1047 = vmatpush3.bf16.msra.mxu0 %v1046_v5 }
  0x3d   : > { %1048 = vmatprep.subr.bf16.mxu0 %v1097_v3 }
  0x40   : > { %1050 = vmatpush3.bf16.msra.mxu0 %v1049_v15 }
  0x41   : > { %1051 = vmatprep.subr.bf16.mxu0 %v1097_v3 }
  0xfa   : > { %v418_v8 = vpop.f32.mrb[0].mxu0 }
  0xfb   : > { %v419_v9 = vadd.f32 %v768_v7, %v418_v8  ;;  %v876_v10 = vpop.f32.mrb[1].mxu0 }
  0xfd   : > { %v422_v11 = vmax.f32 %v419_v9, 0.0 }
  0xff   : > { %v423_v12 = vadd.f32 %v422_v11, %v328_v44  ;;  %v1073_v44 = vpack.c.bf16 %v627_v43, %v626_v42 }
 0x101   : > { %910 = vmatmul.mubr.f32.vlgmr.msra.gmra.mrb[0].mxu1 %v423_v12 }
 0x102   : > { %979 = vmatprep.mubr.msk.f32.mxu1 %vm1098_vm0, %v1099_v6  ;;  %v534_v6 = vld [vmem:[%s1427_s5 + $0x78] sm:$0xff]  ;;  %1056 = vmatpush3.bf16.msra.mxu1 %v1055_v21 }
 0x103   : > { %v1052_v17 = vpack.c.bf16 %v534_v6, %v533_v16  ;;  %1057 = vmatprep.subr.bf16.mxu1 %v1097_v3 }
 0x105   : > { %1053 = vmatpush3.bf16.msra.mxu0 %v1052_v17 }
 0x106   : > { %1059 = vmatpush3.bf16.msra.mxu1 %v1058_v23 }
 0x107   : > { %1060 = vmatprep.subr.bf16.mxu1 %v1097_v3 }
 0x10a   : > { %1062 = vmatpush3.bf16.msra.mxu1 %v1061_v26 }
 0x10b   : > { %1063 = vmatprep.subr.bf16.mxu1 %v1097_v3 }
 0x10e   : > { %1065 = vmatpush3.bf16.msra.mxu1 %v1064_v29 }
 0x10f   : > { %1066 = vmatprep.subr.bf16.mxu1 %v1097_v3 }
 0x112   : > { %1068 = vmatpush3.bf16.msra.mxu1 %v1067_v32 }
 0x113   : > { %1069 = vmatprep.subr.bf16.mxu1 %v1097_v3 }
 0x116   : > { %1071 = vmatpush3.bf16.msra.mxu1 %v1070_v35 }
 0x117   : > { %1072 = vmatprep.subr.bf16.mxu1 %v1097_v3 }
 0x11a   : > { %1074 = vmatpush3.bf16.msra.mxu1 %v1073_v44 }
 0x11b   : > { %1075 = vmatprep.subr.bf16.mxu1 %v1097_v3  ;;  %v771_v3 = vld [vmem:[%s1430_s8] ss:$0 sm:$0xff] }
 0x11e   : > { %1077 = vmatpush3.bf16.msra.mxu1 %v1076_v47 }
 0x1d4   : > { %v513_v37 = vpop.f32.mrb[0].mxu1 }
 0x1d5   : > { %v514_v38 = vadd.f32 %v769_v36, %v513_v37  ;;  %v911_v39 = vpop.f32.mrb[1].mxu1 }
 0x1d7   : > { %v517_v40 = vmax.f32 %v514_v38, 0.0 }
 0x1d9   : > { %v518_v41 = vadd.f32 %v517_v40, %v423_v12 }
 0x1db   : > { %945 = vmatmul.mubr.f32.vlgmr.msra.gmra.mrb[2].mxu0 %v518_v41 }
 0x2ae   : > { %v608_v49 = vpop.f32.mrb[2].mxu0 }
 0x2af   : > { %v609_v50 = vadd.f32 %v770_v48, %v608_v49  ;;  %v946_v51 = vpop.f32.mrb[3].mxu0 }
 0x2b1   : > { %v612_v52 = vmax.f32 %v609_v50, 0.0 }
 0x2b3   : > { %v613_v53 = vadd.f32 %v612_v52, %v518_v41 }
 0x2b5   : > { %980 = vmatmul.mubr.f32.vlgmr.msra.gmra.mrb[2].mxu1 %v613_v53 }
 0x388   : > { %v703_v54 = vpop.f32.mrb[2].mxu1 }
 0x389   : > { %v704_v55 = vadd.f32 %v771_v3, %v703_v54  ;;  %v981_v56 = vpop.f32.mrb[3].mxu1 }
 0x38b   : > { %707 = vst [vmem:[%s327_s24] sm:$0xff] %v704_v55 }
 0x38c PF: > { %s19_s30 = sadd.s32 1, %s1095_s30  }
 0x38d   : > { %p16_p4 = scmp.ge.s32.totalorder %s19_s30, 4  }
 0x38f   :  { %18 = sbr.rel (!%p16_p4) target bundleno = 1 (0x1), region = 86 }

</bundles_post_ra>
